<compile_context>
chip_gen: v5e
topology: v5e:2x2
jax: 0.10.0
libtpu: 0.0.40
codegen_flags: <defaults>
</compile_context>

<pallas_src>
import jax
import jax.numpy as jnp
from jax.experimental import pallas as pl
from jax.experimental.pallas import tpu as pltpu

# TODO(synk): nn.Dropout is a no-op at inference; training-mode stochastic
#             masking is not reproduced here.


def _round_up(x, m):
    return (x + m - 1) // m * m


def _mlp2_kernel(x_ref, w1_ref, b1_ref, w2_ref, b2_ref, o_ref):
    # Layer 0: Linear + ReLU.  MXU matmul with f32 accumulation; bias/ReLU
    # epilogue stays in f32 (cheap everywhere, avoids bf16 VPU issues on v5e).
    h = jnp.dot(x_ref[...], w1_ref[...], preferred_element_type=jnp.float32)
    h = jnp.maximum(h + b1_ref[...], 0.0)
    # Layer 1: Linear (no activation).  Cast hidden back to the weight dtype so
    # the second matmul also runs at the (possibly bf16) MXU rate.
    out = jnp.dot(h.astype(w2_ref.dtype), w2_ref[...],
                  preferred_element_type=jnp.float32)
    o_ref[...] = (out + b2_ref[...]).astype(o_ref.dtype)


def mlp_forward(x, w1, b1, w2, b2, *, tile_n=None, compute_dtype=None):
    """Fused 2-layer MLP forward: relu(x @ w1 + b1) @ w2 + b2.

    x : [N, f_in]           (any N; rows are padded internally)
    w1: [f_in, hid], b1: [hid] or [1, hid]
    w2: [hid, f_out], b2: [f_out] or [1, f_out]
    """
    out_dtype = x.dtype
    if compute_dtype is None:
        compute_dtype = x.dtype

    n, f_in = x.shape
    hid = w1.shape[1]
    f_out = w2.shape[1]

    # ---- choose a large node tile; pad N up to a tile multiple -------------
    if tile_n is None:
        tile_n = min(1024, _round_up(n, 8))
    tile_n = max(8, _round_up(tile_n, 8))
    n_pad = _round_up(n, tile_n)
    grid = (n_pad // tile_n,)

    # ---- lane-dense output: pad the output feature dim to a multiple of 128
    f_out_p = _round_up(max(f_out, 1), 128)

    # ---- wrapper-side padding / dtype casts ---------------------------------
    xp = x.astype(compute_dtype)
    if n_pad != n:
        xp = jnp.pad(xp, ((0, n_pad - n), (0, 0)))
    w1c = w1.astype(compute_dtype)
    w2c = jnp.pad(w2.astype(compute_dtype), ((0, 0), (0, f_out_p - f_out)))
    b1c = jnp.asarray(b1, jnp.float32).reshape(1, hid)
    b2c = jnp.pad(jnp.asarray(b2, jnp.float32).reshape(1, f_out),
                  ((0, 0), (0, f_out_p - f_out)))

    # ---- cost estimate + VMEM budget ----------------------------------------
    c_size = jnp.dtype(compute_dtype).itemsize
    o_size = jnp.dtype(out_dtype).itemsize
    flops = 2 * n_pad * (f_in * hid + hid * f_out_p)
    bytes_accessed = (n_pad * f_in * c_size + n_pad * f_out_p * o_size
                      + f_in * hid * c_size + hid * f_out_p * c_size
                      + (hid + f_out_p) * 4)
    cost = pl.CostEstimate(flops=flops, transcendentals=0,
                           bytes_accessed=bytes_accessed)
    vmem_need = (2 * tile_n * f_in * c_size          # double-buffered x tile
                 + 2 * tile_n * f_out_p * o_size     # double-buffered out tile
                 + tile_n * hid * 4                  # f32 hidden activation
                 + f_in * hid * c_size + hid * f_out_p * c_size  # weights
                 + (hid + f_out_p) * 4)              # biases
    vmem_limit = int(min(100 << 20, max(32 << 20, 3 * vmem_need)))

    out_p = pl.pallas_call(
        _mlp2_kernel,
        out_shape=jax.ShapeDtypeStruct((n_pad, f_out_p), out_dtype),
        grid_spec=pltpu.PrefetchScalarGridSpec(
            num_scalar_prefetch=0,
            grid=grid,
            in_specs=[
                pl.BlockSpec((tile_n, f_in), lambda i: (i, 0)),   # x tile
                pl.BlockSpec((f_in, hid),    lambda i: (0, 0)),   # W1 (broadcast)
                pl.BlockSpec((1, hid),       lambda i: (0, 0)),   # b1
                pl.BlockSpec((hid, f_out_p), lambda i: (0, 0)),   # W2 (padded)
                pl.BlockSpec((1, f_out_p),   lambda i: (0, 0)),   # b2 (padded)
            ],
            out_specs=pl.BlockSpec((tile_n, f_out_p), lambda i: (i, 0)),
        ),
        compiler_params=pltpu.CompilerParams(
            dimension_semantics=("parallel",),
            vmem_limit_bytes=vmem_limit),
        cost_estimate=cost,
    )(xp, w1c, b1c, w2c, b2c)

    # Slice off row / lane padding in the wrapper.
    return out_p[:n, :f_out]


def init_linear(key, in_dim, out_dim, dtype=jnp.float32):
    """Deterministic init mimicking nn.Linear's uniform(-1/sqrt(in), 1/sqrt(in))."""
    kw, kb = jax.random.split(key)
    bound = 1.0 / jnp.sqrt(jnp.float32(in_dim))
    w = jax.random.uniform(kw, (in_dim, out_dim), dtype, -bound, bound)
    b = jax.random.uniform(kb, (1, out_dim), dtype, -bound, bound)
    return w, b


if __name__ == "__main__":
    # param = {'distill_mode': 1, 'student': 'MLP', 'num_layers': 2,
    #          'feat_dim': 32, 'hidden_dim': 64, 'label_dim': 8, 'dropout_t': 0.0}
    num_nodes = 200          # deliberately NOT a multiple of the tile -> pad path
    feat_dim = 32
    hidden_dim = 64
    label_dim = 8

    key = jax.random.PRNGKey(0)
    k_feat, k_l1, k_l2 = jax.random.split(key, 3)

    feats = jax.random.normal(k_feat, (num_nodes, feat_dim), jnp.float32)
    w1, b1 = init_linear(k_l1, feat_dim, hidden_dim)
    w2, b2 = init_linear(k_l2, hidden_dim, label_dim)

    ref = jnp.maximum(feats @ w1 + b1, 0.0) @ w2 + b2

    # f32 path (exact semantics of the PyTorch module).
    out = mlp_forward(feats, w1, b1, w2, b2)
    out = jax.block_until_ready(out)
    assert out.shape == (num_nodes, label_dim)
    assert jnp.allclose(out, ref, atol=1e-4, rtol=1e-4), "f32 mismatch vs reference"

    # bf16 compute path (v6e/v7x MXU throughput option) — looser tolerance.
    out_bf16 = mlp_forward(feats, w1, b1, w2, b2, compute_dtype=jnp.bfloat16)
    out_bf16 = jax.block_until_ready(out_bf16)
    assert out_bf16.shape == (num_nodes, label_dim)
    assert jnp.allclose(out_bf16, ref, atol=5e-2, rtol=5e-2), "bf16 mismatch vs reference"

    print("KERNEL_OK")
</pallas_src>

<mosaic_0001>
module attributes {stable_mosaic.version = 11 : i64} {
  func.func @_mlp2_kernel(%arg0: i32, %arg1: memref<200x32xf32, #tpu.memory_space<vmem>>, %arg2: memref<32x64xf32, #tpu.memory_space<vmem>>, %arg3: memref<1x64xf32, #tpu.memory_space<vmem>>, %arg4: memref<64x128xf32, #tpu.memory_space<vmem>>, %arg5: memref<1x128xf32, #tpu.memory_space<vmem>>, %arg6: memref<200x128xf32, #tpu.memory_space<vmem>>) attributes {dimension_semantics = [#tpu.dimension_semantics<parallel>], iteration_bounds = array<i64: 1>, scalar_prefetch = 0 : i64, scratch_operands = 0 : i64, tpu.core_type = #tpu.core_type<tc>, window_params = [{transform_indices = @transform_0, window_bounds = array<i64: 200, 32>}, {pipeline_mode = #tpu.pipeline_mode<synchronous>, transform_indices = @transform_1, window_bounds = array<i64: 32, 64>}, {pipeline_mode = #tpu.pipeline_mode<synchronous>, transform_indices = @transform_2, window_bounds = array<i64: 1, 64>}, {pipeline_mode = #tpu.pipeline_mode<synchronous>, transform_indices = @transform_3, window_bounds = array<i64: 64, 128>}, {pipeline_mode = #tpu.pipeline_mode<synchronous>, transform_indices = @transform_4, window_bounds = array<i64: 1, 128>}, {transform_indices = @transform_5, window_bounds = array<i64: 200, 128>}]} {
    %c0 = arith.constant 0 : index
    %c0_0 = arith.constant 0 : index
    %0 = vector.load %arg1[%c0, %c0_0] : memref<200x32xf32, #tpu.memory_space<vmem>>, vector<200x32xf32>
    %c0_1 = arith.constant 0 : index
    %c0_2 = arith.constant 0 : index
    %1 = vector.load %arg2[%c0_1, %c0_2] : memref<32x64xf32, #tpu.memory_space<vmem>>, vector<32x64xf32>
    %cst = arith.constant dense<0.000000e+00> : vector<200x64xf32>
    %2 = tpu.matmul %0, %1, %cst {dimension_numbers = #tpu.dot_dimension_numbers<[1], [0], [0], [1], [0, 0, 1, 1], [], []>} : vector<200x32xf32>, vector<32x64xf32>, vector<200x64xf32> -> vector<200x64xf32>
    %c0_3 = arith.constant 0 : index
    %c0_4 = arith.constant 0 : index
    %3 = vector.load %arg3[%c0_3, %c0_4] : memref<1x64xf32, #tpu.memory_space<vmem>>, vector<1x64xf32>
    %4 = vector.broadcast %3 : vector<1x64xf32> to vector<200x64xf32>
    %5 = arith.addf %2, %4 : vector<200x64xf32>
    %cst_5 = arith.constant 0.000000e+00 : f32
    %6 = vector.broadcast %cst_5 : f32 to vector<200x64xf32>
    %7 = arith.maximumf %5, %6 : vector<200x64xf32>
    %c0_6 = arith.constant 0 : index
    %c0_7 = arith.constant 0 : index
    %8 = vector.load %arg4[%c0_6, %c0_7] : memref<64x128xf32, #tpu.memory_space<vmem>>, vector<64x128xf32>
    %cst_8 = arith.constant dense<0.000000e+00> : vector<200x128xf32>
    %9 = tpu.matmul %7, %8, %cst_8 {dimension_numbers = #tpu.dot_dimension_numbers<[1], [0], [0], [1], [0, 0, 1, 1], [], []>} : vector<200x64xf32>, vector<64x128xf32>, vector<200x128xf32> -> vector<200x128xf32>
    %c0_9 = arith.constant 0 : index
    %c0_10 = arith.constant 0 : index
    %10 = vector.load %arg5[%c0_9, %c0_10] : memref<1x128xf32, #tpu.memory_space<vmem>>, vector<1x128xf32>
    %11 = vector.broadcast %10 : vector<1x128xf32> to vector<200x128xf32>
    %12 = arith.addf %9, %11 : vector<200x128xf32>
    %c0_11 = arith.constant 0 : index
    %c0_12 = arith.constant 0 : index
    %13 = vector.load %arg6[%c0_11, %c0_12] : memref<200x128xf32, #tpu.memory_space<vmem>>, vector<200x128xf32>
    tpu.vector_store %arg6[%c0_11, %c0_12], %12 {strides = array<i32>} : memref<200x128xf32, #tpu.memory_space<vmem>>, vector<200x128xf32>,
    return
  }
  func.func @transform_0(%arg0: i32) -> (i32, i32) {
    %c0_i32 = arith.constant 0 : i32
    %c0_i32_0 = arith.constant 0 : i32
    return %arg0, %c0_i32 : i32, i32
  }
  func.func @transform_1(%arg0: i32) -> (i32, i32) {
    %c0_i32 = arith.constant 0 : i32
    %c0_i32_0 = arith.constant 0 : i32
    %c0_i32_1 = arith.constant 0 : i32
    return %c0_i32, %c0_i32_0 : i32, i32
  }
  func.func @transform_2(%arg0: i32) -> (i32, i32) {
    %c0_i32 = arith.constant 0 : i32
    %c0_i32_0 = arith.constant 0 : i32
    %c0_i32_1 = arith.constant 0 : i32
    return %c0_i32, %c0_i32_0 : i32, i32
  }
  func.func @transform_3(%arg0: i32) -> (i32, i32) {
    %c0_i32 = arith.constant 0 : i32
    %c0_i32_0 = arith.constant 0 : i32
    %c0_i32_1 = arith.constant 0 : i32
    return %c0_i32, %c0_i32_0 : i32, i32
  }
  func.func @transform_4(%arg0: i32) -> (i32, i32) {
    %c0_i32 = arith.constant 0 : i32
    %c0_i32_0 = arith.constant 0 : i32
    %c0_i32_1 = arith.constant 0 : i32
    return %c0_i32, %c0_i32_0 : i32, i32
  }
  func.func @transform_5(%arg0: i32) -> (i32, i32) {
    %c0_i32 = arith.constant 0 : i32
    %c0_i32_0 = arith.constant 0 : i32
    return %arg0, %c0_i32 : i32, i32
  }
}

</mosaic_0001>

<bundles_post_ra>
// kernel: tpu_custom_call.1
= control target key start
LH: loop header
LB: loop body
LE: loop exit
PB: predicated region body
PF: predicated region fallthrough
CT: control target
= control target key end

     0   :  { %s828_s0 = inlined_call_operand.vmem [shape: f32[200,32], index: 0, kind: input, shape index: {}]   ;;  %s829_s1 = inlined_call_operand.vmem [shape: f32[32,64], index: 1, kind: input, shape index: {}]   ;;  %s830_s2 = inlined_call_operand.vmem [shape: f32[1,64], index: 2, kind: input, shape index: {}]   ;;  %s831_s3 = inlined_call_operand.vmem [shape: f32[64,128], index: 3, kind: input, shape index: {}]   ;;  %s832_s4 = inlined_call_operand.vmem [shape: f32[1,128], index: 4, kind: input, shape index: {}]   ;;  %s833_s5 = inlined_call_operand.hbm [shape: f32[200,128], index: 5, kind: output, shape index: {}]  }
   0x1   :  { %v49_v0 = vld [vmem:[%s829_s1 + $0x18] sm:$0xff]  ;;  %v48_v1 = vld [vmem:[%s829_s1 + $0x10] sm:$0xff]  ;;  %v47_v2 = vld [vmem:[%s829_s1 + $0x8] sm:$0xff] }
   0x2   :  { %142 = vmatpush.msra.mxu0 %v49_v0  ;;  %520 = vmatpush.msra.mxu3 %v49_v0 }
   0x4   :  { %143 = vmatpush.msra.mxu0 %v48_v1  ;;  %521 = vmatpush.msra.mxu3 %v48_v1 }
   0x5   :  { %10 = vsyncpa [#allocation3], 0  ;;  %v46_v3 = vld [vmem:[%s829_s1] sm:$0xff]  ;;  %vm54_vm0 = vcmask 261120   ;;  %v22_v5 = vld [vmem:[%s828_s0 + $0x8] sm:$0xff]  ;;  %vm259_vm1 = vcmask 523264  }
   0x6   :  { %144 = vmatpush.msra.mxu0 %v47_v2  ;;  %v21_v4 = vld [vmem:[%s828_s0] sm:$0xff]  ;;  %522 = vmatpush.msra.mxu3 %v47_v2  ;;  %v23_v6 = vld [vmem:[%s828_s0 + $0x10] sm:$0xff]  ;;  %v24_v7 = vld [vmem:[%s828_s0 + $0x18] sm:$0xff]  ;;  %s458_s18 = sshll.u32 %s833_s5, 4  ;;  %s572_s19 = smov 128   ;;  %s459_s18 = int_to_ptr.hbm [resolvable:$true] %s458_s18 }
   0x7   :  { %v25_v8 = vld [vmem:[%s828_s0 + $0x20] sm:$0xff]  ;;  %v26_v9 = vld [vmem:[%s828_s0 + $0x28] sm:$0xff]  ;;  %v27_v10 = vld [vmem:[%s828_s0 + $0x30] sm:$0xff]  ;;  %s573_s20 = smov 8  }
   0x8   :  { %145 = vmatpush.msra.mxu0 %v46_v3  ;;  %523 = vmatpush.msra.mxu3 %v46_v3  ;;  %v28_v11 = vld [vmem:[%s828_s0 + $0x38] sm:$0xff]  ;;  %v34_v12 = vld [vmem:[%s828_s0 + $0x68] sm:$0xff]  ;;  %v29_v13 = vld [vmem:[%s828_s0 + $0x40] sm:$0xff] }
   0x9   :  { %470 = vmatmul.msk.f32.vlgmr.msra.gmra.mxu0 %vm54_vm0, %v21_v4  ;;  %483 = vmatmul.msk.f32.vlgmr.msra.gmra.mxu3 %vm54_vm0, %v34_v12  ;;  %v35_v14 = vld [vmem:[%s828_s0 + $0x70] sm:$0xff]  ;;  %v254_v15 = vld [vmem:[%s831_s3 + $0x38] sm:$0xff]  ;;  %v252_v17 = vld [vmem:[%s831_s3 + $0x28] sm:$0xff] }
   0xa   :  { %v253_v16 = vld [vmem:[%s831_s3 + $0x30] sm:$0xff]  ;;  %343 = vmatpush.msra.mxu1 %v254_v15  ;;  %524 = vmatpush.msra.mxu2 %v254_v15  ;;  %v30_v18 = vld [vmem:[%s828_s0 + $0x48] sm:$0xff]  ;;  %v251_v19 = vld [vmem:[%s831_s3 + $0x20] sm:$0xff] }
   0xb   :  { %525 = vmatpush.msrb.mxu3 %v254_v15  ;;  %v36_v20 = vld [vmem:[%s828_s0 + $0x78] sm:$0xff]  ;;  %v31_v22 = vld [vmem:[%s828_s0 + $0x50] sm:$0xff]  ;;  %v37_v23 = vld [vmem:[%s828_s0 + $0x80] sm:$0xff] }
   0xc   :  { %344 = vmatpush.msra.mxu1 %v253_v16  ;;  %526 = vmatpush.msra.mxu2 %v253_v16  ;;  %v250_v21 = vld [vmem:[%s831_s3 + $0x18] sm:$0xff]  ;;  %v38_v25 = vld [vmem:[%s828_s0 + $0x88] sm:$0xff]  ;;  %v249_v26 = vld [vmem:[%s831_s3 + $0x10] sm:$0xff] }
   0xd   :  { %527 = vmatpush.msrb.mxu3 %v253_v16  ;;  %v32_v24 = vld [vmem:[%s828_s0 + $0x58] sm:$0xff]  ;;  %v33_v27 = vld [vmem:[%s828_s0 + $0x60] sm:$0xff]  ;;  %v248_v28 = vld [vmem:[%s831_s3 + $0x8] sm:$0xff] }
   0xe   :  { %345 = vmatpush.msra.mxu1 %v252_v17  ;;  %528 = vmatpush.msra.mxu2 %v252_v17  ;;  %v247_v29 = vld [vmem:[%s831_s3] sm:$0xff]  ;;  %v39_v30 = vld [vmem:[%s828_s0 + $0x90] sm:$0xff]  ;;  %v40_v31 = vld [vmem:[%s828_s0 + $0x98] sm:$0xff] }
   0xf   :  { %529 = vmatpush.msrb.mxu3 %v252_v17  ;;  %v41_v32 = vld [vmem:[%s828_s0 + $0xa0] sm:$0xff]  ;;  %v42_v33 = vld [vmem:[%s828_s0 + $0xa8] sm:$0xff]  ;;  %v43_v38 = vld [vmem:[%s828_s0 + $0xb0] sm:$0xff] }
  0x10   :  { %346 = vmatpush.msra.mxu1 %v251_v19  ;;  %530 = vmatpush.msra.mxu2 %v251_v19  ;;  %v731_v34 = vld [vmem:[%s830_s2] ss:$0 sm:$0xff]  ;;  %v44_v42 = vld [vmem:[%s828_s0 + $0xb8] sm:$0xff] }
  0x11   :  { %471 = vmatmul.msk.f32.gmra.mxu0 %vm54_vm0, %v22_v5  ;;  %484 = vmatmul.msk.f32.gmra.mxu3 %vm54_vm0, %v35_v14  ;;  %v45_v46 = vld [vmem:[%s828_s0 + $0xc0] sm:$0xff] }
  0x12   :  { %347 = vmatpush.msra.mxu1 %v250_v21  ;;  %531 = vmatpush.msrb.mxu3 %v251_v19 }
  0x13   :  { %532 = vmatpush.msra.mxu2 %v250_v21 }
  0x14   :  { %533 = vmatpush.msrb.mxu3 %v250_v21  ;;  %348 = vmatpush.msra.mxu1 %v249_v26 }
  0x15   :  { %534 = vmatpush.msra.mxu2 %v249_v26 }
  0x16   :  { %535 = vmatpush.msrb.mxu3 %v249_v26  ;;  %349 = vmatpush.msra.mxu1 %v248_v28 }
  0x17   :  { %536 = vmatpush.msra.mxu2 %v248_v28 }
  0x18   :  { %537 = vmatpush.msrb.mxu3 %v248_v28  ;;  %350 = vmatpush.msra.mxu1 %v247_v29  ;;  %v781_v28 = vld [vmem:[%s832_s4] ss:$0 sm:$0xff]  ;;  %s571_s4 = smov [#allocation2]  }
  0x19   :  { %472 = vmatmul.msk.f32.gmra.mxu0 %vm54_vm0, %v23_v6  ;;  %485 = vmatmul.msk.f32.gmra.mxu3 %vm54_vm0, %v36_v20  ;;  %s456_s15 = sshll.u32 %s571_s4, 4  ;;  %s457_s15 = int_to_ptr.vmem [resolvable:$true] %s456_s15 }
  0x1a   :  { %538 = vmatpush.msra.mxu2 %v247_v29  ;;  %539 = vmatpush.msrb.mxu3 %v247_v29 }
  0x21   :  { %473 = vmatmul.msk.f32.gmra.mxu0 %vm54_vm0, %v24_v7  ;;  %486 = vmatmul.msk.f32.gmra.mxu3 %vm54_vm0, %v37_v23 }
  0x29   :  { %474 = vmatmul.msk.f32.gmra.mxu0 %vm54_vm0, %v25_v8  ;;  %487 = vmatmul.msk.f32.gmra.mxu3 %vm54_vm0, %v38_v25 }
  0x31   :  { %475 = vmatmul.msk.f32.gmra.mxu0 %vm54_vm0, %v26_v9  ;;  %488 = vmatmul.msk.f32.gmra.mxu3 %vm54_vm0, %v39_v30 }
  0x39   :  { %476 = vmatmul.msk.f32.gmra.mxu0 %vm54_vm0, %v27_v10  ;;  %489 = vmatmul.msk.f32.gmra.mxu3 %vm54_vm0, %v40_v31 }
  0x41   :  { %477 = vmatmul.msk.f32.gmra.mxu0 %vm54_vm0, %v28_v11  ;;  %490 = vmatmul.msk.f32.gmra.mxu3 %vm54_vm0, %v41_v32 }
  0x49   :  { %478 = vmatmul.msk.f32.gmra.mxu0 %vm54_vm0, %v29_v13  ;;  %491 = vmatmul.msk.f32.gmra.mxu3 %vm54_vm0, %v42_v33 }
  0x51   :  { %479 = vmatmul.msk.f32.gmra.mxu0 %vm54_vm0, %v30_v18  ;;  %492 = vmatmul.msk.f32.gmra.mxu3 %vm54_vm0, %v43_v38 }
  0x59   :  { %480 = vmatmul.msk.f32.gmra.mxu0 %vm54_vm0, %v31_v22  ;;  %493 = vmatmul.msk.f32.gmra.mxu3 %vm54_vm0, %v44_v42 }
  0x61   :  { %481 = vmatmul.msk.f32.gmra.mxu0 %vm54_vm0, %v32_v24  ;;  %494 = vmatmul.msk.f32.gmra.mxu3 %vm54_vm0, %v45_v46 }
  0x69   :  { %482 = vmatmul.msk.f32.gmra.mxu0 %vm54_vm0, %v33_v27 }
  0x86   :  { %v147_v35 = vpop.f32.mrf.mxu0 }
  0x87   :  { %v148_v36 = vadd.f32 %v731_v34, %v147_v35 }
  0x89   :  { %v222_v37 = vmax.f32 %v148_v36, 0.0 }
  0x8b   :  { %495 = vmatmul.msk.f32.vlgmr.msra.gmra.mxu1 %vm259_vm1, %v222_v37 }
  0x8c   :  { %v186_v63 = vpop.f32.mrf.mxu3 }
  0x8d   :  { %v187_v18 = vadd.f32 %v731_v34, %v186_v63 }
  0x8e   :  { %v150_v39 = vpop.f32.mrf.mxu0 }
  0x8f   :  { %v151_v40 = vadd.f32 %v731_v34, %v150_v39  ;;  %v235_v20 = vmax.f32 %v187_v18, 0.0 }
  0x91   :  { %v223_v41 = vmax.f32 %v151_v40, 0.0 }
  0x93   :  { %496 = vmatmul.msk.f32.gmra.mxu1 %vm259_vm1, %v223_v41 }
  0x94   :  { %v189_v3 = vpop.f32.mrf.mxu3 }
  0x95   :  { %v190_v21 = vadd.f32 %v731_v34, %v189_v3 }
  0x96   :  { %v153_v43 = vpop.f32.mrf.mxu0 }
  0x97   :  { %v154_v44 = vadd.f32 %v731_v34, %v153_v43  ;;  %v236_v23 = vmax.f32 %v190_v21, 0.0 }
  0x99   :  { %v224_v45 = vmax.f32 %v154_v44, 0.0 }
  0x9b   :  { %497 = vmatmul.msk.f32.gmra.mxu1 %vm259_vm1, %v224_v45 }
  0x9c   :  { %v192_v7 = vpop.f32.mrf.mxu3 }
  0x9d   :  { %v193_v24 = vadd.f32 %v731_v34, %v192_v7 }
  0x9e   :  { %v156_v47 = vpop.f32.mrf.mxu0 }
  0x9f   :  { %v157_v48 = vadd.f32 %v731_v34, %v156_v47  ;;  %v237_v26 = vmax.f32 %v193_v24, 0.0 }
  0xa1   :  { %v225_v49 = vmax.f32 %v157_v48, 0.0 }
  0xa3   :  { %498 = vmatmul.msk.f32.gmra.mxu1 %vm259_vm1, %v225_v49 }
  0xa4   :  { %v195_v11 = vpop.f32.mrf.mxu3 }
  0xa5   :  { %v196_v27 = vadd.f32 %v731_v34, %v195_v11 }
  0xa6   :  { %v159_v50 = vpop.f32.mrf.mxu0 }
  0xa7   :  { %v160_v51 = vadd.f32 %v731_v34, %v159_v50  ;;  %v238_v31 = vmax.f32 %v196_v27, 0.0 }
  0xa9   :  { %v226_v52 = vmax.f32 %v160_v51, 0.0 }
  0xab   :  { %499 = vmatmul.msk.f32.gmra.mxu1 %vm259_vm1, %v226_v52 }
  0xac   :  { %v198_v15 = vpop.f32.mrf.mxu3 }
  0xad   :  { %v199_v33 = vadd.f32 %v731_v34, %v198_v15 }
  0xae   :  { %v162_v53 = vpop.f32.mrf.mxu0 }
  0xaf   :  { %v163_v54 = vadd.f32 %v731_v34, %v162_v53  ;;  %v239_v37 = vmax.f32 %v199_v33, 0.0 }
  0xb1   :  { %v227_v55 = vmax.f32 %v163_v54, 0.0 }
  0xb3   :  { %500 = vmatmul.msk.f32.gmra.mxu1 %vm259_vm1, %v227_v55 }
  0xb4   :  { %v201_v19 = vpop.f32.mrf.mxu3 }
  0xb5   :  { %v202_v39 = vadd.f32 %v731_v34, %v201_v19 }
  0xb6   :  { %v165_v56 = vpop.f32.mrf.mxu0 }
  0xb7   :  { %v166_v57 = vadd.f32 %v731_v34, %v165_v56  ;;  %v240_v42 = vmax.f32 %v202_v39, 0.0 }
  0xb9   :  { %v228_v58 = vmax.f32 %v166_v57, 0.0 }
  0xbb   :  { %501 = vmatmul.msk.f32.gmra.mxu1 %vm259_vm1, %v228_v58 }
  0xbc   :  { %v204_v22 = vpop.f32.mrf.mxu3 }
  0xbd   :  { %v205_v44 = vadd.f32 %v731_v34, %v204_v22 }
  0xbe   :  { %v168_v59 = vpop.f32.mrf.mxu0 }
  0xbf   :  { %v169_v60 = vadd.f32 %v731_v34, %v168_v59  ;;  %v241_v48 = vmax.f32 %v205_v44, 0.0 }
  0xc1   :  { %v229_v61 = vmax.f32 %v169_v60, 0.0 }
  0xc3   :  { %502 = vmatmul.msk.f32.gmra.mxu1 %vm259_vm1, %v229_v61 }
  0xc4   :  { %v207_v25 = vpop.f32.mrf.mxu3 }
  0xc5   :  { %v208_v51 = vadd.f32 %v731_v34, %v207_v25 }
  0xc6   :  { %v171_v62 = vpop.f32.mrf.mxu0 }
  0xc7   :  { %v172_v0 = vadd.f32 %v731_v34, %v171_v62  ;;  %v242_v53 = vmax.f32 %v208_v51, 0.0 }
  0xc9   :  { %v230_v1 = vmax.f32 %v172_v0, 0.0 }
  0xcb   :  { %503 = vmatmul.msk.f32.gmra.mxu1 %vm259_vm1, %v230_v1 }
  0xcc   :  { %v210_v29 = vpop.f32.mrf.mxu3 }
  0xcd   :  { %v211_v55 = vadd.f32 %v731_v34, %v210_v29 }
  0xce   :  { %v174_v2 = vpop.f32.mrf.mxu0 }
  0xcf   :  { %v175_v4 = vadd.f32 %v731_v34, %v174_v2  ;;  %v243_v57 = vmax.f32 %v211_v55, 0.0 }
  0xd1   :  { %v231_v5 = vmax.f32 %v175_v4, 0.0 }
  0xd3   :  { %504 = vmatmul.msk.f32.gmra.mxu1 %vm259_vm1, %v231_v5 }
  0xd4   :  { %v213_v35 = vpop.f32.mrf.mxu3 }
  0xd5   :  { %v214_v59 = vadd.f32 %v731_v34, %v213_v35 }
  0xd6   :  { %v177_v6 = vpop.f32.mrf.mxu0 }
  0xd7   :  { %v178_v8 = vadd.f32 %v731_v34, %v177_v6  ;;  %v244_v61 = vmax.f32 %v214_v59, 0.0 }
  0xd9   :  { %v232_v9 = vmax.f32 %v178_v8, 0.0 }
  0xdb   :  { %505 = vmatmul.msk.f32.gmra.mxu1 %vm259_vm1, %v232_v9 }
  0xdc   :  { %v216_v40 = vpop.f32.mrf.mxu3 }
  0xdd   :  { %v217_v63 = vadd.f32 %v731_v34, %v216_v40 }
  0xde   :  { %v180_v10 = vpop.f32.mrf.mxu0 }
  0xdf   :  { %v181_v12 = vadd.f32 %v731_v34, %v180_v10  ;;  %v245_v1 = vmax.f32 %v217_v63, 0.0 }
  0xe1   :  { %v233_v13 = vmax.f32 %v181_v12, 0.0 }
  0xe3   :  { %506 = vmatmul.msk.f32.gmra.mxu1 %vm259_vm1, %v233_v13 }
  0xe4   :  { %v219_v45 = vpop.f32.mrf.mxu3 }
  0xe5   :  { %v220_v46 = vadd.f32 %v731_v34, %v219_v45 }
  0xe6   :  { %v183_v14 = vpop.f32.mrf.mxu0 }
  0xe7   :  { %v184_v16 = vadd.f32 %v731_v34, %v183_v14  ;;  %v246_v50 = vmax.f32 %v220_v46, 0.0 }
  0xe9   :  { %v234_v17 = vmax.f32 %v184_v16, 0.0  ;;  %519 = vmatmul.msk.f32.vlgmr.msrb.gmra.mxu3 %vm259_vm1, %v246_v50 }
  0xeb   :  { %507 = vmatmul.msk.f32.vlgmr.msra.gmra.mxu2 %vm259_vm1, %v234_v17 }
  0xf3   :  { %508 = vmatmul.msk.f32.gmra.mxu2 %vm259_vm1, %v235_v20 }
  0xfb   :  { %509 = vmatmul.msk.f32.gmra.mxu2 %vm259_vm1, %v236_v23 }
 0x103   :  { %510 = vmatmul.msk.f32.gmra.mxu2 %vm259_vm1, %v237_v26 }
 0x108   :  { %v352_v30 = vpop.f32.mrf.mxu1 }
 0x109   :  { %v353_v32 = vadd.f32 %v781_v28, %v352_v30 }
 0x10b   :  { %427 = vst [vmem:[#allocation2] sm:$0xff] %v353_v32  ;;  %511 = vmatmul.msk.f32.gmra.mxu2 %vm259_vm1, %v238_v31 }
 0x110   :  { %v355_v36 = vpop.f32.mrf.mxu1 }
 0x111   :  { %v356_v38 = vadd.f32 %v781_v28, %v355_v36 }
 0x113   :  { %428 = vst [vmem:[#allocation2 + $0x8] sm:$0xff] %v356_v38  ;;  %512 = vmatmul.msk.f32.gmra.mxu2 %vm259_vm1, %v239_v37 }
 0x118   :  { %v358_v41 = vpop.f32.mrf.mxu1 }
 0x119   :  { %v359_v43 = vadd.f32 %v781_v28, %v358_v41 }
 0x11b   :  { %429 = vst [vmem:[#allocation2 + $0x10] sm:$0xff] %v359_v43  ;;  %513 = vmatmul.msk.f32.gmra.mxu2 %vm259_vm1, %v240_v42 }
 0x120   :  { %v361_v47 = vpop.f32.mrf.mxu1 }
 0x121   :  { %v362_v49 = vadd.f32 %v781_v28, %v361_v47 }
 0x123   :  { %430 = vst [vmem:[#allocation2 + $0x18] sm:$0xff] %v362_v49  ;;  %514 = vmatmul.msk.f32.gmra.mxu2 %vm259_vm1, %v241_v48 }
 0x128   :  { %v364_v52 = vpop.f32.mrf.mxu1 }
 0x129   :  { %v365_v54 = vadd.f32 %v781_v28, %v364_v52 }
 0x12b   :  { %431 = vst [vmem:[#allocation2 + $0x20] sm:$0xff] %v365_v54  ;;  %515 = vmatmul.msk.f32.gmra.mxu2 %vm259_vm1, %v242_v53 }
 0x130   :  { %v367_v56 = vpop.f32.mrf.mxu1 }
 0x131   :  { %v368_v58 = vadd.f32 %v781_v28, %v367_v56 }
 0x133   :  { %432 = vst [vmem:[#allocation2 + $0x28] sm:$0xff] %v368_v58  ;;  %516 = vmatmul.msk.f32.gmra.mxu2 %vm259_vm1, %v243_v57 }
 0x138   :  { %v370_v60 = vpop.f32.mrf.mxu1 }
 0x139   :  { %v371_v62 = vadd.f32 %v781_v28, %v370_v60 }
 0x13b   :  { %433 = vst [vmem:[#allocation2 + $0x30] sm:$0xff] %v371_v62  ;;  %517 = vmatmul.msk.f32.gmra.mxu2 %vm259_vm1, %v244_v61 }
 0x140   :  { %v373_v0 = vpop.f32.mrf.mxu1 }
 0x141   :  { %v374_v2 = vadd.f32 %v781_v28, %v373_v0 }
 0x143   :  { %434 = vst [vmem:[#allocation2 + $0x38] sm:$0xff] %v374_v2  ;;  %518 = vmatmul.msk.f32.gmra.mxu2 %vm259_vm1, %v245_v1 }
 0x148   :  { %v376_v3 = vpop.f32.mrf.mxu1 }
 0x149   :  { %v377_v4 = vadd.f32 %v781_v28, %v376_v3 }
 0x14b   :  { %435 = vst [vmem:[#allocation2 + $0x40] sm:$0xff] %v377_v4 }
 0x150   :  { %v379_v5 = vpop.f32.mrf.mxu1 }
 0x151   :  { %v380_v6 = vadd.f32 %v781_v28, %v379_v5 }
 0x153   :  { %436 = vst [vmem:[#allocation2 + $0x48] sm:$0xff] %v380_v6 }
 0x158   :  { %v382_v7 = vpop.f32.mrf.mxu1 }
 0x159   :  { %v383_v8 = vadd.f32 %v781_v28, %v382_v7 }
 0x15b   :  { %437 = vst [vmem:[#allocation2 + $0x50] sm:$0xff] %v383_v8 }
 0x160   :  { %v385_v34 = vpop.f32.mrf.mxu1 }
 0x161   :  { %v386_v9 = vadd.f32 %v781_v28, %v385_v34 }
 0x163   :  { %438 = vst [vmem:[#allocation2 + $0x58] sm:$0xff] %v386_v9 }
 0x16c   :  { %v424_v25 = vpop.f32.mrf.mxu3 }
 0x16d   :  { %v425_v27 = vadd.f32 %v781_v28, %v424_v25 }
 0x16e   :  { %v388_v10 = vpop.f32.mrf.mxu2 }
 0x16f   :  { %v389_v11 = vadd.f32 %v781_v28, %v388_v10  ;;  %451 = vst [vmem:[#allocation2 + $0xc0] sm:$0xff] %v425_v27 }
 0x171   :  { %439 = vst [vmem:[#allocation2 + $0x60] sm:$0xff] %v389_v11 }
 0x176   :  { %v391_v12 = vpop.f32.mrf.mxu2 }
 0x177   :  { %v392_v13 = vadd.f32 %v781_v28, %v391_v12 }
 0x179   :  { %440 = vst [vmem:[#allocation2 + $0x68] sm:$0xff] %v392_v13 }
 0x17e   :  { %v394_v14 = vpop.f32.mrf.mxu2 }
 0x17f   :  { %v395_v15 = vadd.f32 %v781_v28, %v394_v14 }
 0x181   :  { %441 = vst [vmem:[#allocation2 + $0x70] sm:$0xff] %v395_v15 }
 0x186   :  { %v397_v16 = vpop.f32.mrf.mxu2 }
 0x187   :  { %v398_v17 = vadd.f32 %v781_v28, %v397_v16 }
 0x189   :  { %442 = vst [vmem:[#allocation2 + $0x78] sm:$0xff] %v398_v17 }
 0x18e   :  { %v400_v18 = vpop.f32.mrf.mxu2 }
 0x18f   :  { %v401_v19 = vadd.f32 %v781_v28, %v400_v18 }
 0x191   :  { %443 = vst [vmem:[#allocation2 + $0x80] sm:$0xff] %v401_v19 }
 0x196   :  { %v403_v20 = vpop.f32.mrf.mxu2 }
 0x197   :  { %v404_v21 = vadd.f32 %v781_v28, %v403_v20 }
 0x199   :  { %444 = vst [vmem:[#allocation2 + $0x88] sm:$0xff] %v404_v21 }
 0x19e   :  { %v406_v22 = vpop.f32.mrf.mxu2 }
 0x19f   :  { %v407_v23 = vadd.f32 %v781_v28, %v406_v22 }
 0x1a1   :  { %445 = vst [vmem:[#allocation2 + $0x90] sm:$0xff] %v407_v23 }
 0x1a6   :  { %v409_v24 = vpop.f32.mrf.mxu2 }
 0x1a7   :  { %v410_v26 = vadd.f32 %v781_v28, %v409_v24 }
 0x1a9   :  { %446 = vst [vmem:[#allocation2 + $0x98] sm:$0xff] %v410_v26 }
 0x1ae   :  { %v412_v29 = vpop.f32.mrf.mxu2 }
 0x1af   :  { %v413_v30 = vadd.f32 %v781_v28, %v412_v29 }
 0x1b1   :  { %447 = vst [vmem:[#allocation2 + $0xa0] sm:$0xff] %v413_v30 }
 0x1b6   :  { %v415_v31 = vpop.f32.mrf.mxu2 }
 0x1b7   :  { %v416_v32 = vadd.f32 %v781_v28, %v415_v31 }
 0x1b9   :  { %448 = vst [vmem:[#allocation2 + $0xa8] sm:$0xff] %v416_v32 }
 0x1be   :  { %v418_v33 = vpop.f32.mrf.mxu2 }
 0x1bf   :  { %v419_v35 = vadd.f32 %v781_v28, %v418_v33 }
 0x1c1   :  { %449 = vst [vmem:[#allocation2 + $0xb0] sm:$0xff] %v419_v35 }
 0x1c6   :  { %v421_v36 = vpop.f32.mrf.mxu2 }
 0x1c7   :  { %v422_v37 = vadd.f32 %v781_v28, %v421_v36 }
 0x1c9   :  { %450 = vst [vmem:[#allocation2 + $0xb8] sm:$0xff] %v422_v37 }
 0x1ca   :  { %464 = dma.vmem_to_hbm [thread:$0]  %s457_s15, 3200, %s459_s18, [#allocation3], %s572_s19, %s572_s19, %s573_s20  }
 0x1cb   :  { %569 = dma.done.wait [#allocation3], 3200  }
 0x1cc   :  { %570 = vsyncadd [#allocation3], 4294964096 }
 0x1cd   :  { %469 = vsyncpa [#allocation3], 1 }

</bundles_post_ra>
